<compile_context>
chip_gen: v7x
topology: tpu7x:2x2x1
jax: 0.10.0
libtpu: 0.0.40
codegen_flags: <defaults>
</compile_context>

<pallas_src>
import functools

import jax
import jax.numpy as jnp
from jax.experimental import pallas as pl
from jax.experimental.pallas import tpu as pltpu

_LANE = 128
_SUBLANE = 8


def _round_up(n, m):
    return ((n + m - 1) // m) * m


# ----------------------------- activation helper -----------------------------
def _apply_activation(y, name, *, exact_sigmoid):
    name = str(name).lower()
    if name == "relu":
        return jnp.maximum(y, 0.0)
    if name == "relu6":
        return jnp.clip(y, 0.0, 6.0)
    if name == "leakyrelu":
        return jnp.where(y >= 0.0, y, 0.01 * y)  # PyTorch default negative_slope=0.01
    if name == "sigmoid":
        if exact_sigmoid:
            # Exact divide -> strictly in (0,1) for finite logits (BCELoss-safe).
            return 1.0 / (1.0 + jnp.exp(-y))
        # Hidden-layer option only: EUP-slot approx reciprocal.
        return pl.reciprocal(1.0 + jnp.exp(-y), approx=True)
    return jnp.maximum(y, 0.0)  # PyTorch fallback is ReLU


# ------------------------------- fused Pallas kernel --------------------------
def _fused_mlp_kernel(*refs, layer_count, hidden_activation, output_activation, real_batch):
    x_ref = refs[0]
    o_ref = refs[-1]
    param_refs = refs[1:-1]

    h = x_ref[...]                       # (batch_pad, in_pad) f32, stays on-chip
    padded_batch = h.shape[0]
    inv_n = 1.0 / float(real_batch)
    needs_mask = real_batch != padded_batch

    row_ok = None
    if needs_mask:
        # Hoisted once: (batch_pad, 1) validity mask. Padded rows of h are kept at
        # exactly zero, so (bias-free) linear outputs of padded rows are zero and
        # BN batch statistics need no per-layer iota/mask rebuild.
        row_ok = jax.lax.broadcasted_iota(jnp.int32, (padded_batch, 1), 0) < real_batch
        h = jnp.where(row_ok, h, 0.0)

    idx = 0
    for i in range(layer_count):
        is_last = i == layer_count - 1
        if not is_last:
            w_ref = param_refs[idx]
            gamma_ref = param_refs[idx + 1]
            beta_ref = param_refs[idx + 2]
            idx += 3
            # Linear. Bias intentionally omitted: a per-feature constant shift
            # cancels exactly under batch-statistics BatchNorm.
            y = jnp.dot(h, w_ref[...], preferred_element_type=jnp.float32)
            # BatchNorm1d(track_running_stats=False): batch stats, biased var, eps=1e-5.
            # Two-pass (mean, then centered SSQ) — numerically robust; padded rows of
            # y are exactly zero, so the mean needs no mask.
            mean = jnp.sum(y, axis=0, keepdims=True) * inv_n
            d = y - mean
            if needs_mask:
                d = jnp.where(row_ok, d, 0.0)
            var = jnp.sum(d * d, axis=0, keepdims=True) * inv_n
            y = d * jax.lax.rsqrt(var + 1e-5) * gamma_ref[...] + beta_ref[...]
            h = _apply_activation(y, hidden_activation, exact_sigmoid=False)
            if needs_mask:
                h = jnp.where(row_ok, h, 0.0)   # restore the zero-padded-rows invariant
        else:
            w_ref = param_refs[idx]
            b_ref = param_refs[idx + 1]
            idx += 2
            y = jnp.dot(h, w_ref[...], preferred_element_type=jnp.float32) + b_ref[...]
            # Exact sigmoid for the output (BCELoss needs strict (0,1)).
            o_ref[...] = _apply_activation(y, output_activation, exact_sigmoid=True)


# --------------------------------- wrapper ------------------------------------
def _pad2(a, rows, cols):
    r, c = a.shape
    return jnp.pad(a.astype(jnp.float32), ((0, rows - r), (0, cols - c)))


def prepare_params(params, input_size):
    """Pad all parameters to lane-aligned shapes ONCE (hoisted out of the per-call
    path). Hidden-layer biases are dropped (exact under batch-statistics BN).
    Returns (flat tuple of padded arrays, meta dict)."""
    layer_count = len(params)
    in_p = _round_up(input_size, _LANE)
    out_size = params[-1][0].shape[1]

    flat = []
    prev_p = in_p
    for i, p in enumerate(params):
        if i != layer_count - 1:
            w, _b, gamma, beta = p           # hidden-layer bias folded away (exact under BN)
            fan_out_p = _round_up(w.shape[1], _LANE)
            flat.append(_pad2(w, prev_p, fan_out_p))
            flat.append(_pad2(gamma, 1, fan_out_p))
            flat.append(_pad2(beta, 1, fan_out_p))
        else:
            w, b = p
            fan_out_p = _round_up(w.shape[1], _LANE)
            flat.append(_pad2(w, prev_p, fan_out_p))
            flat.append(_pad2(b, 1, fan_out_p))
        prev_p = fan_out_p

    meta = dict(layer_count=layer_count, in_padded=in_p, out_padded=prev_p,
                out_size=out_size, input_size=input_size)
    return tuple(jax.device_put(f) for f in flat), meta


def make_forward(padded_params, meta, hidden_activation="relu", output_activation="sigmoid"):
    """Build a jitted forward(x) closure. Only x is padded per call; all parameters
    were padded once in prepare_params and stay VMEM-resident inside one fused
    pallas_call."""
    layer_count = meta["layer_count"]
    in_p = meta["in_padded"]
    out_p = meta["out_padded"]
    out_size = meta["out_size"]
    param_bytes = sum(int(p.size) for p in padded_params) * 4

    @jax.jit
    def forward(x):
        batch, in_size = x.shape
        batch_p = _round_up(batch, _SUBLANE)
        x_p = jnp.pad(x.astype(jnp.float32), ((0, batch_p - batch), (0, in_p - in_size)))

        kernel = functools.partial(
            _fused_mlp_kernel,
            layer_count=layer_count,
            hidden_activation=hidden_activation,
            output_activation=output_activation,
            real_batch=batch,
        )
        # Scoped VMEM sized from the actual footprint (+ headroom), not a blanket 32 MiB.
        total_bytes = param_bytes + 4 * batch_p * (in_p + out_p)
        vmem_limit = max(2 * total_bytes + (1 << 20), 2 * 1024 * 1024)

        vmem_spec = pl.BlockSpec(memory_space=pltpu.MemorySpace.VMEM)
        out_padded = pl.pallas_call(
            kernel,
            out_shape=jax.ShapeDtypeStruct((batch_p, out_p), jnp.float32),
            in_specs=[vmem_spec] * (1 + len(padded_params)),
            out_specs=vmem_spec,
            compiler_params=pltpu.CompilerParams(vmem_limit_bytes=int(vmem_limit)),
        )(x_p, *padded_params)
        return out_padded[:batch, :out_size]

    return forward


# ------------------------------ param init ------------------------------------
def init_params(key, input_size, hidden_size, output_size, layer_count):
    """PyTorch-style init: Linear W,b ~ U(-1/sqrt(fan_in), 1/sqrt(fan_in));
    BatchNorm gamma=1, beta=0. W stored as (in, out) (transpose of PyTorch)."""
    params = []
    for i in range(layer_count):
        fan_in = input_size if i == 0 else hidden_size
        fan_out = hidden_size if i != layer_count - 1 else output_size
        key, kw, kb = jax.random.split(key, 3)
        bound = 1.0 / jnp.sqrt(jnp.float32(fan_in))
        w = jax.random.uniform(kw, (fan_in, fan_out), jnp.float32, -bound, bound)
        b = jax.random.uniform(kb, (1, fan_out), jnp.float32, -bound, bound)
        if i != layer_count - 1:
            gamma = jnp.ones((1, fan_out), jnp.float32)
            beta = jnp.zeros((1, fan_out), jnp.float32)
            params.append((w, b, gamma, beta))
        else:
            params.append((w, b))
    return params


# ---------------------------------- main --------------------------------------
if __name__ == "__main__":
    batch = 8
    input_size = 8
    hidden_size = 32
    output_size = 1
    layer_count = 3
    hidden_activation = "relu"
    output_activation = "sigmoid"  # model uses BCELoss -> sigmoid output

    key = jax.random.PRNGKey(0)
    key, kx = jax.random.split(key)
    x = jax.random.normal(kx, (batch, input_size), jnp.float32)

    params = init_params(key, input_size, hidden_size, output_size, layer_count)
    padded_params, meta = prepare_params(params, input_size)   # one-time padding
    forward = make_forward(padded_params, meta, hidden_activation, output_activation)

    out = forward(x)
    out = jax.block_until_ready(out)

    assert out.shape == (batch, output_size)
    assert bool(jnp.all((out > 0.0) & (out < 1.0)))
    print("KERNEL_OK")
</pallas_src>

<mosaic_0001>
module attributes {stable_mosaic.version = 11 : i64} {
  func.func @_fused_mlp_kernel(%arg0: memref<8x128xf32, #tpu.memory_space<vmem>>, %arg1: memref<128x128xf32, #tpu.memory_space<vmem>>, %arg2: memref<1x128xf32, #tpu.memory_space<vmem>>, %arg3: memref<1x128xf32, #tpu.memory_space<vmem>>, %arg4: memref<128x128xf32, #tpu.memory_space<vmem>>, %arg5: memref<1x128xf32, #tpu.memory_space<vmem>>, %arg6: memref<1x128xf32, #tpu.memory_space<vmem>>, %arg7: memref<128x128xf32, #tpu.memory_space<vmem>>, %arg8: memref<1x128xf32, #tpu.memory_space<vmem>>, %arg9: memref<8x128xf32, #tpu.memory_space<vmem>>) attributes {dimension_semantics = [], scalar_prefetch = 0 : i64, scratch_operands = 0 : i64, tpu.core_type = #tpu.core_type<tc>} {
    %c0 = arith.constant 0 : index
    %c0_0 = arith.constant 0 : index
    %0 = vector.load %arg0[%c0, %c0_0] : memref<8x128xf32, #tpu.memory_space<vmem>>, vector<8x128xf32>
    %c0_1 = arith.constant 0 : index
    %c0_2 = arith.constant 0 : index
    %1 = vector.load %arg1[%c0_1, %c0_2] : memref<128x128xf32, #tpu.memory_space<vmem>>, vector<128x128xf32>
    %cst = arith.constant dense<0.000000e+00> : vector<8x128xf32>
    %2 = tpu.matmul %0, %1, %cst {dimension_numbers = #tpu.dot_dimension_numbers<[1], [0], [0], [1], [0, 0, 1, 1], [], []>} : vector<8x128xf32>, vector<128x128xf32>, vector<8x128xf32> -> vector<8x128xf32>
    %cst_3 = arith.constant dense<0.000000e+00> : vector<128xf32>
    %3 = vector.multi_reduction <add>, %2, %cst_3 [0] : vector<8x128xf32> to vector<128xf32>
    %4 = vector.shape_cast %3 : vector<128xf32> to vector<1x128xf32>
    %cst_4 = arith.constant 1.250000e-01 : f32
    %5 = vector.broadcast %cst_4 : f32 to vector<1x128xf32>
    %6 = arith.mulf %4, %5 : vector<1x128xf32>
    %7 = vector.broadcast %6 : vector<1x128xf32> to vector<8x128xf32>
    %8 = arith.subf %2, %7 : vector<8x128xf32>
    %9 = arith.mulf %8, %8 : vector<8x128xf32>
    %cst_5 = arith.constant dense<0.000000e+00> : vector<128xf32>
    %10 = vector.multi_reduction <add>, %9, %cst_5 [0] : vector<8x128xf32> to vector<128xf32>
    %11 = vector.shape_cast %10 : vector<128xf32> to vector<1x128xf32>
    %cst_6 = arith.constant 1.250000e-01 : f32
    %12 = vector.broadcast %cst_6 : f32 to vector<1x128xf32>
    %13 = arith.mulf %11, %12 : vector<1x128xf32>
    %cst_7 = arith.constant 9.99999974E-6 : f32
    %14 = vector.broadcast %cst_7 : f32 to vector<1x128xf32>
    %15 = arith.addf %13, %14 : vector<1x128xf32>
    %16 = math.rsqrt %15 : vector<1x128xf32>
    %17 = vector.broadcast %16 : vector<1x128xf32> to vector<8x128xf32>
    %18 = arith.mulf %8, %17 : vector<8x128xf32>
    %c0_8 = arith.constant 0 : index
    %c0_9 = arith.constant 0 : index
    %19 = vector.load %arg2[%c0_8, %c0_9] : memref<1x128xf32, #tpu.memory_space<vmem>>, vector<1x128xf32>
    %20 = vector.broadcast %19 : vector<1x128xf32> to vector<8x128xf32>
    %21 = arith.mulf %18, %20 : vector<8x128xf32>
    %c0_10 = arith.constant 0 : index
    %c0_11 = arith.constant 0 : index
    %22 = vector.load %arg3[%c0_10, %c0_11] : memref<1x128xf32, #tpu.memory_space<vmem>>, vector<1x128xf32>
    %23 = vector.broadcast %22 : vector<1x128xf32> to vector<8x128xf32>
    %24 = arith.addf %21, %23 : vector<8x128xf32>
    %cst_12 = arith.constant 0.000000e+00 : f32
    %25 = vector.broadcast %cst_12 : f32 to vector<8x128xf32>
    %26 = arith.maximumf %24, %25 : vector<8x128xf32>
    %c0_13 = arith.constant 0 : index
    %c0_14 = arith.constant 0 : index
    %27 = vector.load %arg4[%c0_13, %c0_14] : memref<128x128xf32, #tpu.memory_space<vmem>>, vector<128x128xf32>
    %cst_15 = arith.constant dense<0.000000e+00> : vector<8x128xf32>
    %28 = tpu.matmul %26, %27, %cst_15 {dimension_numbers = #tpu.dot_dimension_numbers<[1], [0], [0], [1], [0, 0, 1, 1], [], []>} : vector<8x128xf32>, vector<128x128xf32>, vector<8x128xf32> -> vector<8x128xf32>
    %cst_16 = arith.constant dense<0.000000e+00> : vector<128xf32>
    %29 = vector.multi_reduction <add>, %28, %cst_16 [0] : vector<8x128xf32> to vector<128xf32>
    %30 = vector.shape_cast %29 : vector<128xf32> to vector<1x128xf32>
    %cst_17 = arith.constant 1.250000e-01 : f32
    %31 = vector.broadcast %cst_17 : f32 to vector<1x128xf32>
    %32 = arith.mulf %30, %31 : vector<1x128xf32>
    %33 = vector.broadcast %32 : vector<1x128xf32> to vector<8x128xf32>
    %34 = arith.subf %28, %33 : vector<8x128xf32>
    %35 = arith.mulf %34, %34 : vector<8x128xf32>
    %cst_18 = arith.constant dense<0.000000e+00> : vector<128xf32>
    %36 = vector.multi_reduction <add>, %35, %cst_18 [0] : vector<8x128xf32> to vector<128xf32>
    %37 = vector.shape_cast %36 : vector<128xf32> to vector<1x128xf32>
    %cst_19 = arith.constant 1.250000e-01 : f32
    %38 = vector.broadcast %cst_19 : f32 to vector<1x128xf32>
    %39 = arith.mulf %37, %38 : vector<1x128xf32>
    %cst_20 = arith.constant 9.99999974E-6 : f32
    %40 = vector.broadcast %cst_20 : f32 to vector<1x128xf32>
    %41 = arith.addf %39, %40 : vector<1x128xf32>
    %42 = math.rsqrt %41 : vector<1x128xf32>
    %43 = vector.broadcast %42 : vector<1x128xf32> to vector<8x128xf32>
    %44 = arith.mulf %34, %43 : vector<8x128xf32>
    %c0_21 = arith.constant 0 : index
    %c0_22 = arith.constant 0 : index
    %45 = vector.load %arg5[%c0_21, %c0_22] : memref<1x128xf32, #tpu.memory_space<vmem>>, vector<1x128xf32>
    %46 = vector.broadcast %45 : vector<1x128xf32> to vector<8x128xf32>
    %47 = arith.mulf %44, %46 : vector<8x128xf32>
    %c0_23 = arith.constant 0 : index
    %c0_24 = arith.constant 0 : index
    %48 = vector.load %arg6[%c0_23, %c0_24] : memref<1x128xf32, #tpu.memory_space<vmem>>, vector<1x128xf32>
    %49 = vector.broadcast %48 : vector<1x128xf32> to vector<8x128xf32>
    %50 = arith.addf %47, %49 : vector<8x128xf32>
    %cst_25 = arith.constant 0.000000e+00 : f32
    %51 = vector.broadcast %cst_25 : f32 to vector<8x128xf32>
    %52 = arith.maximumf %50, %51 : vector<8x128xf32>
    %c0_26 = arith.constant 0 : index
    %c0_27 = arith.constant 0 : index
    %53 = vector.load %arg7[%c0_26, %c0_27] : memref<128x128xf32, #tpu.memory_space<vmem>>, vector<128x128xf32>
    %cst_28 = arith.constant dense<0.000000e+00> : vector<8x128xf32>
    %54 = tpu.matmul %52, %53, %cst_28 {dimension_numbers = #tpu.dot_dimension_numbers<[1], [0], [0], [1], [0, 0, 1, 1], [], []>} : vector<8x128xf32>, vector<128x128xf32>, vector<8x128xf32> -> vector<8x128xf32>
    %c0_29 = arith.constant 0 : index
    %c0_30 = arith.constant 0 : index
    %55 = vector.load %arg8[%c0_29, %c0_30] : memref<1x128xf32, #tpu.memory_space<vmem>>, vector<1x128xf32>
    %56 = vector.broadcast %55 : vector<1x128xf32> to vector<8x128xf32>
    %57 = arith.addf %54, %56 : vector<8x128xf32>
    %cst_31 = arith.constant 0.000000e+00 : f32
    %58 = vector.broadcast %cst_31 : f32 to vector<8x128xf32>
    %59 = arith.subf %58, %57 : vector<8x128xf32>
    %60 = math.exp %59 : vector<8x128xf32>
    %cst_32 = arith.constant 1.000000e+00 : f32
    %61 = vector.broadcast %cst_32 : f32 to vector<8x128xf32>
    %62 = arith.addf %61, %60 : vector<8x128xf32>
    %cst_33 = arith.constant 1.000000e+00 : f32
    %63 = vector.broadcast %cst_33 : f32 to vector<8x128xf32>
    %64 = arith.divf %63, %62 : vector<8x128xf32>
    %c0_34 = arith.constant 0 : index
    %c0_35 = arith.constant 0 : index
    %65 = vector.load %arg9[%c0_34, %c0_35] : memref<8x128xf32, #tpu.memory_space<vmem>>, vector<8x128xf32>
    tpu.vector_store %arg9[%c0_34, %c0_35], %64 {strides = array<i32>} : memref<8x128xf32, #tpu.memory_space<vmem>>, vector<8x128xf32>,
    return
  }
}

</mosaic_0001>

<bundles_post_ra>
// kernel: forward.1
= control target key start
LH: loop header
LB: loop body
LE: loop exit
PB: predicated region body
PF: predicated region fallthrough
CT: control target
= control target key end

     0   :  { %14 = vsyncpa [#allocation3], 0  ;;  %s901_s0 = inlined_call_operand.vmem [shape: f32[8,128], index: 0, kind: input, shape index: {}]   ;;  %s902_s1 = inlined_call_operand.hbm [shape: f32[128,128], index: 1, kind: input, shape index: {}]   ;;  %s903_s2 = inlined_call_operand.vmem [shape: f32[1,128], index: 2, kind: input, shape index: {}, may-alias: {2,5}]   ;;  %s904_s3 = inlined_call_operand.vmem [shape: f32[1,128], index: 3, kind: input, shape index: {}, may-alias: {3,6}]   ;;  %s905_s4 = inlined_call_operand.hbm [shape: f32[128,128], index: 4, kind: input, shape index: {}]   ;;  %s906_s5 = inlined_call_operand.vmem [shape: f32[1,128], index: 5, kind: input, shape index: {}, may-alias: {2,5}]   ;;  %s907_s6 = inlined_call_operand.vmem [shape: f32[1,128], index: 6, kind: input, shape index: {}, may-alias: {3,6}]   ;;  %s908_s7 = inlined_call_operand.hbm [shape: f32[128,128], index: 7, kind: input, shape index: {}]   ;;  %s909_s8 = inlined_call_operand.vmem [shape: f32[1,128], index: 8, kind: input, shape index: {}]   ;;  %s910_s9 = inlined_call_operand.vmem [shape: f32[8,128], index: 9, kind: output, shape index: {}]  }
   0x1   :  { %15 = vsyncpa [#allocation5], 0  ;;  %s743_s30 = smov [#allocation4]   ;;  %s744_s11 = smov [#allocation2]  }
   0x2   :  { %s39_s10 = sshll.u32 %s743_s30, 4  ;;  %s23_s12 = sshll.u32 %s744_s11, 4  ;;  %s40_s10 = int_to_ptr.vmem [resolvable:$true] %s39_s10  ;;  %s801_s12 = int_to_ptr.vmem [resolvable:$true] %s23_s12 }
   0x3   :  { %s673_s15 = scalar_lea.hbm %s905_s4, 2048 }
   0x4   :  { %p674_p0 = scmp.ne.s32.totalorder %s905_s4, %s673_s15  ;;  %p677_p1 = scmp.lt.u32.totalorder %s673_s15, %s905_s4 }
   0x6   :  { %p679_p2 = pnand %p677_p1, %p674_p0 }
   0x8   :  { %682 = shalt.err (!%p679_p2)
}
   0x9   :  { %s683_s20 = scalar_lea.vmem %s40_s10, 2048  ;;  %p688_p4 = scmp.lt.s32.totalorder %s40_s10, %s40_s10 }
   0xa   :  { %p684_p3 = scmp.ne.s32.totalorder %s40_s10, %s683_s20  ;;  %p689_p5 = scmp.lt.s32.totalorder %s683_s20, %s683_s20 }
   0xc   :  { %p690_p6 = por %p689_p5, %p688_p4 }
   0xe   :  { %p691_p7 = pnand %p690_p6, %p684_p3 }
  0x10   :  { %694 = shalt.err (!%p691_p7)
}
  0x11   :  { %s745_s21 = smov 128   ;;  %s746_s22 = smov 8  }
  0x12   :  { %45 = dma.hbm_to_vmem [thread:$0]  %s905_s4, 2048, %s40_s10, [#allocation5], %s745_s21, %s745_s21, %s746_s22  }
  0x13   :  { %s695_s27 = scalar_lea.hbm %s902_s1, 2048 }
  0x14   :  { %p696_p8 = scmp.ne.s32.totalorder %s902_s1, %s695_s27  ;;  %p699_p9 = scmp.lt.u32.totalorder %s695_s27, %s902_s1 }
  0x16   :  { %p701_p10 = pnand %p699_p9, %p696_p8 }
  0x18   :  { %704 = shalt.err (!%p701_p10)
}
  0x19   :  { %s705_s13 = scalar_lea.vmem %s801_s12, 2048  ;;  %p710_p12 = scmp.lt.s32.totalorder %s801_s12, %s801_s12 }
  0x1a   :  { %p706_p11 = scmp.ne.s32.totalorder %s801_s12, %s705_s13  ;;  %p711_p13 = scmp.lt.s32.totalorder %s705_s13, %s705_s13 }
  0x1c   :  { %p712_p0 = por %p711_p13, %p710_p12 }
  0x1e   :  { %p713_p1 = pnand %p712_p0, %p706_p11 }
  0x20   :  { %716 = shalt.err (!%p713_p1)
}
  0x21   :  { %29 = dma.hbm_to_vmem [thread:$0]  %s902_s1, 2048, %s801_s12, [#allocation3], %s745_s21, %s745_s21, %s746_s22  }
  0x22   :  { %s747_s14 = smov [#allocation6]   ;;  %s717_s18 = scalar_lea.hbm %s908_s7, 2048 }
  0x23   :  { %s55_s15 = sshll.u32 %s747_s14, 4  ;;  %p718_p2 = scmp.ne.s32.totalorder %s908_s7, %s717_s18  ;;  %s56_s15 = int_to_ptr.vmem [resolvable:$true] %s55_s15 }
  0x24   :  { %p721_p3 = scmp.lt.u32.totalorder %s717_s18, %s908_s7 }
  0x26   :  { %p723_p4 = pnand %p721_p3, %p718_p2 }
  0x28   :  { %726 = shalt.err (!%p723_p4)
}
  0x29   :  { %s727_s25 = scalar_lea.vmem %s56_s15, 2048  ;;  %p732_p6 = scmp.lt.s32.totalorder %s56_s15, %s56_s15 }
  0x2a   :  { %p728_p5 = scmp.ne.s32.totalorder %s56_s15, %s727_s25  ;;  %p733_p7 = scmp.lt.s32.totalorder %s727_s25, %s727_s25 }
  0x2c   :  { %p734_p8 = por %p733_p7, %p732_p6 }
  0x2e   :  { %p735_p9 = pnand %p734_p8, %p728_p5 }
  0x30   :  { %738 = shalt.err (!%p735_p9)
}
  0x31   :  { %61 = dma.hbm_to_vmem [thread:$0]  %s908_s7, 2048, %s56_s15, [#allocation5], %s745_s21, %s745_s21, %s746_s22  }
  0x32   :  { %739 = dma.done.wait [#allocation3], 2048  }
  0x33   :  { %740 = vsyncadd [#allocation3], 4294965248 }
  0x34   :  { %741 = dma.done.wait [#allocation5], 4096  }
  0x35   :  { %742 = vsyncadd [#allocation5], 4294963200  ;;  %v748_v0 = vmov 0.0|0.0   ;;  %vm749_vm0 = vmmov 0   ;;  %v750_v1 = vmov 0.0   ;;  %v74_v2 = vld [vmem:[#allocation2] sm:$0xff] }
  0x36   :  { %585 = vmatprep.subr.bf16.mxu0 %v748_v0  ;;  %512 = vmatprep.mubr.msk.f32.mxu0 %vm749_vm0, %v750_v1  ;;  %v75_v3 = vld [vmem:[#allocation2 + $0x8] sm:$0xff]  ;;  %v76_v4 = vld [vmem:[#allocation2 + $0x10] sm:$0xff]  ;;  %v77_v6 = vld [vmem:[#allocation2 + $0x18] sm:$0xff] }
  0x37   :  { %609 = vmatprep.subr.bf16.mxu1 %v748_v0  ;;  %547 = vmatprep.mubr.msk.f32.mxu1 %vm749_vm0, %v750_v1  ;;  %v586_v5 = vpack.c.bf16 %v75_v3, %v74_v2  ;;  %v589_v7 = vpack.c.bf16 %v77_v6, %v76_v4  ;;  %v78_v8 = vld [vmem:[#allocation2 + $0x20] sm:$0xff]  ;;  %v79_v9 = vld [vmem:[#allocation2 + $0x28] sm:$0xff]  ;;  %v80_v11 = vld [vmem:[#allocation2 + $0x30] sm:$0xff] }
  0x38   :  { %v592_v10 = vpack.c.bf16 %v79_v9, %v78_v8  ;;  %v81_v12 = vld [vmem:[#allocation2 + $0x38] sm:$0xff]  ;;  %v82_v14 = vld [vmem:[#allocation2 + $0x40] sm:$0xff]  ;;  %v83_v15 = vld [vmem:[#allocation2 + $0x48] sm:$0xff] }
  0x39   :  { %587 = vmatpush3.bf16.msra.mxu0 %v586_v5  ;;  %v595_v13 = vpack.c.bf16 %v81_v12, %v80_v11  ;;  %v598_v16 = vpack.c.bf16 %v83_v15, %v82_v14  ;;  %v84_v17 = vld [vmem:[#allocation2 + $0x50] sm:$0xff]  ;;  %v85_v18 = vld [vmem:[#allocation2 + $0x58] sm:$0xff]  ;;  %v86_v20 = vld [vmem:[#allocation2 + $0x60] sm:$0xff] }
  0x3a   :  { %588 = vmatprep.subr.bf16.mxu0 %v748_v0  ;;  %v601_v19 = vpack.c.bf16 %v85_v18, %v84_v17  ;;  %v87_v21 = vld [vmem:[#allocation2 + $0x68] sm:$0xff]  ;;  %v88_v23 = vld [vmem:[#allocation2 + $0x70] sm:$0xff]  ;;  %v89_v24 = vld [vmem:[#allocation2 + $0x78] sm:$0xff] }
  0x3b   :  { %v604_v22 = vpack.c.bf16 %v87_v21, %v86_v20  ;;  %v607_v25 = vpack.c.bf16 %v89_v24, %v88_v23  ;;  %v73_v26 = vld [vmem:[%s901_s0] sm:$0xff]  ;;  %v197_v28 = vld [vmem:[#allocation4 + $0x8] sm:$0xff]  ;;  %v198_v30 = vld [vmem:[#allocation4 + $0x10] sm:$0xff] }
  0x3c   :  { %v196_v27 = vld [vmem:[#allocation4] sm:$0xff]  ;;  %v199_v31 = vld [vmem:[#allocation4 + $0x18] sm:$0xff]  ;;  %v201_v34 = vld [vmem:[#allocation4 + $0x28] sm:$0xff] }
  0x3d   :  { %590 = vmatpush3.bf16.msra.mxu0 %v589_v7  ;;  %v610_v29 = vpack.c.bf16 %v197_v28, %v196_v27  ;;  %v613_v32 = vpack.c.bf16 %v199_v31, %v198_v30  ;;  %v200_v33 = vld [vmem:[#allocation4 + $0x20] sm:$0xff]  ;;  %v202_v36 = vld [vmem:[#allocation4 + $0x30] sm:$0xff]  ;;  %v203_v37 = vld [vmem:[#allocation4 + $0x38] sm:$0xff] }
  0x3e   :  { %591 = vmatprep.subr.bf16.mxu0 %v748_v0  ;;  %v616_v35 = vpack.c.bf16 %v201_v34, %v200_v33  ;;  %v619_v38 = vpack.c.bf16 %v203_v37, %v202_v36  ;;  %v204_v39 = vld [vmem:[#allocation4 + $0x40] sm:$0xff]  ;;  %v205_v40 = vld [vmem:[#allocation4 + $0x48] sm:$0xff]  ;;  %v206_v42 = vld [vmem:[#allocation4 + $0x50] sm:$0xff] }
  0x3f   :  { %611 = vmatpush3.bf16.msra.mxu1 %v610_v29  ;;  %v622_v41 = vpack.c.bf16 %v205_v40, %v204_v39  ;;  %v207_v43 = vld [vmem:[#allocation4 + $0x58] sm:$0xff]  ;;  %v208_v45 = vld [vmem:[#allocation4 + $0x60] sm:$0xff]  ;;  %v209_v46 = vld [vmem:[#allocation4 + $0x68] sm:$0xff] }
  0x40   :  { %612 = vmatprep.subr.bf16.mxu1 %v748_v0  ;;  %v625_v44 = vpack.c.bf16 %v207_v43, %v206_v42  ;;  %v628_v47 = vpack.c.bf16 %v209_v46, %v208_v45  ;;  %v210_v48 = vld [vmem:[#allocation4 + $0x70] sm:$0xff]  ;;  %v211_v49 = vld [vmem:[#allocation4 + $0x78] sm:$0xff]  ;;  %v424_v8 = vld [vmem:[%s903_s2] ss:$0 sm:$0xff] }
  0x41   :  { %593 = vmatpush3.bf16.msra.mxu0 %v592_v10  ;;  %v631_v50 = vpack.c.bf16 %v211_v49, %v210_v48  ;;  %v425_v10 = vld [vmem:[%s904_s3] ss:$0 sm:$0xff]  ;;  %v319_v15 = vld [vmem:[#allocation6 + $0x8] sm:$0xff]  ;;  %v320_v17 = vld [vmem:[#allocation6 + $0x10] sm:$0xff] }
  0x42   :  { %594 = vmatprep.subr.bf16.mxu0 %v748_v0  ;;  %v318_v14 = vld [vmem:[#allocation6] sm:$0xff]  ;;  %v321_v18 = vld [vmem:[#allocation6 + $0x18] sm:$0xff]  ;;  %v323_v21 = vld [vmem:[#allocation6 + $0x28] sm:$0xff] }
  0x43   :  { %614 = vmatpush3.bf16.msra.mxu1 %v613_v32  ;;  %v322_v20 = vld [vmem:[#allocation6 + $0x20] sm:$0xff]  ;;  %v324_v23 = vld [vmem:[#allocation6 + $0x30] sm:$0xff]  ;;  %v325_v24 = vld [vmem:[#allocation6 + $0x38] sm:$0xff] }
  0x44   :  { %615 = vmatprep.subr.bf16.mxu1 %v748_v0  ;;  %v327_v27 = vld [vmem:[#allocation6 + $0x48] sm:$0xff]  ;;  %v328_v29 = vld [vmem:[#allocation6 + $0x50] sm:$0xff]  ;;  %v329_v30 = vld [vmem:[#allocation6 + $0x58] sm:$0xff] }
  0x45   :  { %596 = vmatpush3.bf16.msra.mxu0 %v595_v13  ;;  %v649_v31 = vpack.c.bf16 %v329_v30, %v328_v29  ;;  %v330_v32 = vld [vmem:[#allocation6 + $0x60] sm:$0xff]  ;;  %v331_v33 = vld [vmem:[#allocation6 + $0x68] sm:$0xff]  ;;  %v333_v36 = vld [vmem:[#allocation6 + $0x78] sm:$0xff] }
  0x46   :  { %597 = vmatprep.subr.bf16.mxu0 %v748_v0  ;;  %v652_v34 = vpack.c.bf16 %v331_v33, %v330_v32 }
  0x47   :  { %617 = vmatpush3.bf16.msra.mxu1 %v616_v35  ;;  %v332_v35 = vld [vmem:[#allocation6 + $0x70] sm:$0xff] }
  0x48   :  { %618 = vmatprep.subr.bf16.mxu1 %v748_v0  ;;  %v655_v37 = vpack.c.bf16 %v333_v36, %v332_v35 }
  0x49   :  { %599 = vmatpush3.bf16.msra.mxu0 %v598_v16  ;;  %v634_v16 = vpack.c.bf16 %v319_v15, %v318_v14 }
  0x4a   :  { %600 = vmatprep.subr.bf16.mxu0 %v748_v0 }
  0x4b   :  { %620 = vmatpush3.bf16.msra.mxu1 %v619_v38 }
  0x4c   :  { %621 = vmatprep.subr.bf16.mxu1 %v748_v0 }
  0x4d   :  { %602 = vmatpush3.bf16.msra.mxu0 %v601_v19  ;;  %v637_v19 = vpack.c.bf16 %v321_v18, %v320_v17 }
  0x4e   :  { %603 = vmatprep.subr.bf16.mxu0 %v748_v0 }
  0x4f   :  { %623 = vmatpush3.bf16.msra.mxu1 %v622_v41 }
  0x50   :  { %624 = vmatprep.subr.bf16.mxu1 %v748_v0 }
  0x51   :  { %605 = vmatpush3.bf16.msra.mxu0 %v604_v22  ;;  %v640_v22 = vpack.c.bf16 %v323_v21, %v322_v20 }
  0x52   :  { %606 = vmatprep.subr.bf16.mxu0 %v748_v0 }
  0x53   :  { %626 = vmatpush3.bf16.msra.mxu1 %v625_v44 }
  0x54   :  { %627 = vmatprep.subr.bf16.mxu1 %v748_v0 }
  0x55   :  { %608 = vmatpush3.bf16.msra.mxu0 %v607_v25  ;;  %v643_v25 = vpack.c.bf16 %v325_v24, %v324_v23 }
  0x56   :  { %633 = vmatprep.subr.bf16.mxu0 %v748_v0 }
  0x57   :  { %629 = vmatpush3.bf16.msra.mxu1 %v628_v47 }
  0x58   :  { %513 = vmatmul.mubr.f32.vlgmr.msra.gmra.mrb[0].mxu0 %v73_v26  ;;  %630 = vmatprep.subr.bf16.mxu1 %v748_v0  ;;  %v326_v26 = vld [vmem:[#allocation6 + $0x40] sm:$0xff] }
  0x59   :  { %582 = vmatprep.mubr.msk.f32.mxu0 %vm749_vm0, %v750_v1  ;;  %635 = vmatpush3.bf16.msra.mxu0 %v634_v16  ;;  %v646_v28 = vpack.c.bf16 %v327_v27, %v326_v26 }
  0x5a   :  { %636 = vmatprep.subr.bf16.mxu0 %v748_v0 }
  0x5b   :  { %632 = vmatpush3.bf16.msra.mxu1 %v631_v50 }
  0x5d   :  { %638 = vmatpush3.bf16.msra.mxu0 %v637_v19 }
  0x5e   :  { %639 = vmatprep.subr.bf16.mxu0 %v748_v0 }
  0x61   :  { %641 = vmatpush3.bf16.msra.mxu0 %v640_v22 }
  0x62   :  { %642 = vmatprep.subr.bf16.mxu0 %v748_v0 }
  0x65   :  { %644 = vmatpush3.bf16.msra.mxu0 %v643_v25 }
  0x66   :  { %645 = vmatprep.subr.bf16.mxu0 %v748_v0 }
  0x69   :  { %647 = vmatpush3.bf16.msra.mxu0 %v646_v28 }
  0x6a   :  { %648 = vmatprep.subr.bf16.mxu0 %v748_v0 }
  0x6d   :  { %650 = vmatpush3.bf16.msra.mxu0 %v649_v31 }
  0x6e   :  { %651 = vmatprep.subr.bf16.mxu0 %v748_v0 }
  0x71   :  { %653 = vmatpush3.bf16.msra.mxu0 %v652_v34 }
  0x72   :  { %654 = vmatprep.subr.bf16.mxu0 %v748_v0 }
  0x75   :  { %656 = vmatpush3.bf16.msra.mxu0 %v655_v37 }
 0x12b   :  { %v156_v51 = vpop.f32.mrb[0].mxu0 }
 0x12c   :  { %v160_v52 = vrot.slane %v156_v51, 4  ;;  %v514_v53 = vpop.f32.mrb[1].mxu0 }
 0x12e   :  { %v161_v54 = vadd.f32 %v160_v52, %v156_v51 }
 0x130   :  { %v162_v55 = vrot.slane %v161_v54, 2 }
 0x132   :  { %v163_v56 = vadd.f32 %v162_v55, %v161_v54 }
 0x134   :  { %v164_v57 = vrot.slane %v163_v56, 1 }
 0x136   :  { %v165_v58 = vadd.f32 %v164_v57, %v163_v56  ;;  %v426_v57 = vld [vmem:[%s906_s5] ss:$0 sm:$0xff] }
 0x138   :  { %v166_v59 = vmul.f32 0.125, %v165_v58 }
 0x13a   :  { %v167_v60 = vsub.f32 %v156_v51, %v166_v59  ;;  %v427_v59 = vld [vmem:[%s907_s6] ss:$0 sm:$0xff] }
 0x13c   :  { %v168_v61 = vmul.f32 %v167_v60, %v167_v60 }
 0x13e   :  { %v169_v62 = vrot.slane %v168_v61, 4 }
 0x140   :  { %v170_v63 = vadd.f32 %v169_v62, %v168_v61 }
 0x142   :  { %v171_v1 = vrot.slane %v170_v63, 2 }
 0x144   :  { %v172_v2 = vadd.f32 %v171_v1, %v170_v63  ;;  %v428_v63 = vld [vmem:[%s909_s8] ss:$0 sm:$0xff] }
 0x146   :  { %v173_v3 = vrot.slane %v172_v2, 1 }
 0x148   :  { %v174_v4 = vadd.f32 %v173_v3, %v172_v2 }
 0x14a   :  { %v175_v5 = vmul.f32 0.125, %v174_v4 }
 0x14c   :  { %v176_v6 = vadd.f32 1e-05, %v175_v5 }
 0x14e   :  { %665 = vrsqrt.f32 %v176_v6 }
 0x158   :  { %v666_v7 = vpop.eup %665 }
 0x159   :  { %v178_v9 = vmul.f32 %v666_v7, %v167_v60 }
 0x15b   :  { %v186_v11 = vmul.f32 %v424_v8, %v178_v9 }
 0x15d   :  { %v194_v12 = vadd.f32 %v425_v10, %v186_v11 }
 0x15f   :  { %v195_v13 = vmax.f32 %v194_v12, 0.0 }
 0x161   :  { %548 = vmatmul.mubr.f32.vlgmr.msra.gmra.mrb[0].mxu1 %v195_v13 }
 0x234   :  { %v278_v38 = vpop.f32.mrb[0].mxu1 }
 0x235   :  { %v282_v39 = vrot.slane %v278_v38, 4  ;;  %v549_v40 = vpop.f32.mrb[1].mxu1 }
 0x237   :  { %v283_v41 = vadd.f32 %v282_v39, %v278_v38 }
 0x239   :  { %v284_v42 = vrot.slane %v283_v41, 2 }
 0x23b   :  { %v285_v43 = vadd.f32 %v284_v42, %v283_v41 }
 0x23d   :  { %v286_v44 = vrot.slane %v285_v43, 1 }
 0x23f   :  { %v287_v45 = vadd.f32 %v286_v44, %v285_v43 }
 0x241   :  { %v288_v46 = vmul.f32 0.125, %v287_v45 }
 0x243   :  { %v289_v47 = vsub.f32 %v278_v38, %v288_v46 }
 0x245   :  { %v290_v48 = vmul.f32 %v289_v47, %v289_v47 }
 0x247   :  { %v291_v49 = vrot.slane %v290_v48, 4 }
 0x249   :  { %v292_v50 = vadd.f32 %v291_v49, %v290_v48 }
 0x24b   :  { %v293_v51 = vrot.slane %v292_v50, 2 }
 0x24d   :  { %v294_v52 = vadd.f32 %v293_v51, %v292_v50 }
 0x24f   :  { %v295_v0 = vrot.slane %v294_v52, 1 }
 0x251   :  { %v296_v53 = vadd.f32 %v295_v0, %v294_v52 }
 0x253   :  { %v297_v54 = vmul.f32 0.125, %v296_v53 }
 0x255   :  { %v298_v55 = vadd.f32 1e-05, %v297_v54 }
 0x257   :  { %667 = vrsqrt.f32 %v298_v55 }
 0x261   :  { %v668_v56 = vpop.eup %667 }
 0x262   :  { %v300_v58 = vmul.f32 %v668_v56, %v289_v47 }
 0x264   :  { %v308_v60 = vmul.f32 %v426_v57, %v300_v58 }
 0x266   :  { %v316_v61 = vadd.f32 %v427_v59, %v308_v60 }
 0x268   :  { %v317_v62 = vmax.f32 %v316_v61, 0.0 }
 0x26a   :  { %583 = vmatmul.mubr.f32.vlgmr.msra.gmra.mrb[2].mxu0 %v317_v62 }
 0x33d   :  { %v407_v1 = vpop.f32.mrb[2].mxu0 }
 0x33e   :  { %v408_v2 = vadd.f32 %v428_v63, %v407_v1  ;;  %v584_v3 = vpop.f32.mrb[3].mxu0 }
 0x340   :  { %v411_v4 = vsub.f32 0.0, %v408_v2 }
 0x342   :  { %v412_v5 = vmul.f32 1.442695, %v411_v4 }
 0x344   :  { %669 = vpow2.f32 %v412_v5 }
 0x34e   :  { %v670_v6 = vpop.eup %669 }
 0x34f   :  { %v414_v7 = vadd.f32 1.0, %v670_v6 }
 0x351   :  { %671 = vrcp.f32 %v414_v7 }
 0x35b   :  { %v672_v8 = vpop.eup %671 }
 0x35c   :  { %417 = vst [vmem:[%s910_s9] sm:$0xff] %v672_v8 }
 0x35d   :  { %422 = vsyncpa [#allocation3], 1 }
 0x35e   :  { %423 = vsyncpa [#allocation5], 1 }

</bundles_post_ra>
